<compile_context>
chip_gen: v6e
topology: v6e:2x2x1
jax: 0.10.0
libtpu: 0.0.40
codegen_flags: <defaults>
</compile_context>

<pallas_src>
import jax
import jax.numpy as jnp
from jax import lax
from jax.experimental import pallas as pl
from jax.experimental.pallas import tpu as pltpu


MXU_BF16 = True        # bf16 MXU inputs, f32 accumulation (per perf review)


def _round_up(x, m):
    return ((x + m - 1) // m) * m


def _mxu_dot(a, b):
    if MXU_BF16:
        a = a.astype(jnp.bfloat16)
        b = b.astype(jnp.bfloat16)
    return jnp.dot(a, b, preferred_element_type=jnp.float32)


def _prep_rhs(w):
    """Pre-cast a weight operand once (hoisted out of unrolled loops)."""
    return w.astype(jnp.bfloat16) if MXU_BF16 else w


def _mxu_dot_rhs(a, w_pre):
    if MXU_BF16:
        a = a.astype(jnp.bfloat16)
    return jnp.dot(a, w_pre, preferred_element_type=jnp.float32)


def _vmem_caps():
    """Chip-aware VMEM capacity / scoped-limit (v5e/v6e: 128 MiB, v7x: 64 MiB)."""
    try:
        cap = int(pltpu.get_tpu_info().vmem_capacity_bytes)
    except Exception:
        cap = 64 << 20                       # conservative fallback (v7x-safe)
    limit = max(32 << 20, min(cap - (16 << 20), int(cap * 0.8)))
    return cap, limit


def _const_spec(block_shape):
    """Constant-index BlockSpec; single-buffered where pipeline_mode exists."""
    nd = len(block_shape)
    idx = lambda *args, _nd=nd: (0,) * _nd
    try:
        return pl.BlockSpec(block_shape, idx, pipeline_mode=pl.Buffered(1))
    except TypeError:
        return pl.BlockSpec(block_shape, idx)


# ----------------------------------------------------------------------------
# Kernel 1 (fused, per branch): visual MLP -> squared distance to l_emb ->
# masked pooling (snippet mask + single-clip mask).
#   grid = (n_par [parallel snippet split], n_tiles [arbitrary / reduction])
#   scratch: per-batch num/den accumulators (snippet and clip, kept separate)
#   output: (n_par, B, 4) partial sums [num_s, den_s, num_c, den_c]
# ----------------------------------------------------------------------------
def _fused_visual_kernel(feat_ref, mask_ref, clip_ref, l_ref,
                         w1_ref, b1_ref, w2_ref, b2_ref,
                         o_ref, ns_acc, ds_acc, nc_acc, dc_acc):
    nt = pl.program_id(1)

    @pl.when(nt == 0)
    def _():
        ns_acc[...] = jnp.zeros_like(ns_acc)
        ds_acc[...] = jnp.zeros_like(ds_acc)
        nc_acc[...] = jnp.zeros_like(nc_acc)
        dc_acc[...] = jnp.zeros_like(dc_acc)

    x = feat_ref[...]                                  # (B, TN, Dv)
    B, TN, Dv = x.shape

    # MLP: Linear -> ReLU -> Linear   (Dropout == identity in eval)
    h = _mxu_dot(x.reshape(B * TN, Dv), w1_ref[...]) + b1_ref[...]
    h = jnp.maximum(h, 0.0)
    v = _mxu_dot(h, w2_ref[...]) + b2_ref[...]          # (B*TN, E)
    v = v.reshape(B, TN, -1)

    # squared distance to the (broadcast) language embedding
    diff = v - l_ref[...][:, None, :]
    d = jnp.sum(diff * diff, axis=-1)                   # (B, TN)

    m = mask_ref[...]                                   # (B, TN)
    mc = clip_ref[...]                                  # (B, TN)

    ns_acc[...] += jnp.sum(d * m, axis=-1, keepdims=True)
    ds_acc[...] += jnp.sum(m, axis=-1, keepdims=True)
    nc_acc[...] += jnp.sum(d * mc, axis=-1, keepdims=True)
    dc_acc[...] += jnp.sum(mc, axis=-1, keepdims=True)

    @pl.when(nt == pl.num_programs(1) - 1)
    def _():
        o_ref[0] = jnp.concatenate(
            [ns_acc[...], ds_acc[...], nc_acc[...], dc_acc[...]], axis=-1)


def _plan_visual_tiles(B, N, Dv, H, E, feat_bytes):
    """Snippet-tile plan with VMEM accounting for blocks + MLP intermediates."""
    _, limit = _vmem_caps()
    budget = int(limit * 0.7)
    # fixed: weights (+ bf16 staging), l_emb, accumulators
    fixed = (Dv * H + H * E + H + E) * (4 + 2) + B * E * 4 + 4 * B * 128 * 4
    # per snippet-row (x B batch rows): double-buffered feat + masks, bf16
    # staging copies for the MXU, MLP intermediates h/v, diff/d scratch.
    per_row = B * (2 * Dv * feat_bytes + Dv * 2
                   + 2 * 4 * 2 * 2
                   + H * (4 + 2)
                   + 2 * E * 4
                   + 8 * 4)
    n128 = _round_up(N, 128)                 # lane-dense mask / compare work
    max_rows = max(128, (budget - fixed) // max(per_row, 1))
    if n128 <= max_rows:
        tile_n, npad = n128, n128
    else:
        tile_n = max(128, (max_rows // 128) * 128)
        npad = _round_up(N, tile_n)
    n_tiles = npad // tile_n
    n_par = 2 if (n_tiles >= 2 and n_tiles % 2 == 0) else 1
    return tile_n, npad, n_par, n_tiles // n_par, limit


def fused_visual_compare_pallas(feat, mask, clip, l_emb, w1, b1, w2, b2):
    """feat: (B, N, Dv); mask/clip: (B, N); l_emb: (B, E) -> ((B,), (B,))."""
    # TODO(synk): for very large B*Dv (e.g. B=128, Dv=4096) also tile the batch
    # axis; current plan only tiles the snippet axis.
    B, N, Dv = feat.shape
    H = w1.shape[1]
    E = w2.shape[1]

    tile_n, npad, n_par, tiles_pp, vmem_limit = _plan_visual_tiles(
        B, N, Dv, H, E, feat.dtype.itemsize)
    if npad != N:
        feat = jnp.pad(feat, ((0, 0), (0, npad - N), (0, 0)))
        mask = jnp.pad(mask, ((0, 0), (0, npad - N)))
        clip = jnp.pad(clip, ((0, 0), (0, npad - N)))

    partial = pl.pallas_call(
        _fused_visual_kernel,
        out_shape=jax.ShapeDtypeStruct((n_par, B, 4), jnp.float32),
        grid=(n_par, tiles_pp),
        in_specs=[
            pl.BlockSpec((B, tile_n, Dv), lambda p, n, _t=tiles_pp: (0, p * _t + n, 0)),
            pl.BlockSpec((B, tile_n), lambda p, n, _t=tiles_pp: (0, p * _t + n)),
            pl.BlockSpec((B, tile_n), lambda p, n, _t=tiles_pp: (0, p * _t + n)),
            _const_spec((B, E)),
            _const_spec((Dv, H)),
            _const_spec((1, H)),
            _const_spec((H, E)),
            _const_spec((1, E)),
        ],
        out_specs=pl.BlockSpec((1, B, 4), lambda p, n: (p, 0, 0)),
        scratch_shapes=[pltpu.VMEM((B, 1), jnp.float32)] * 4,
        compiler_params=pltpu.CompilerParams(
            dimension_semantics=("parallel", "arbitrary"),
            vmem_limit_bytes=vmem_limit),
    )(feat, mask, clip, l_emb, w1, b1.reshape(1, -1), w2, b2.reshape(1, -1))

    sums = jnp.sum(partial, axis=0)                       # (B, 4)
    # NOTE: zero mask rows yield inf/nan, matching the PyTorch reference.
    return sums[:, 0] / sums[:, 1], sums[:, 2] / sums[:, 3]


# ----------------------------------------------------------------------------
# Kernel 2: tiled Linear (used to hoist the LSTM input projection)
# ----------------------------------------------------------------------------
def _linear_kernel(x_ref, w_ref, b_ref, o_ref):
    o_ref[...] = (_mxu_dot(x_ref[...], w_ref[...]) + b_ref[...]).astype(o_ref.dtype)


def linear_pallas(x, w, b, tile_m=1024):
    M, Din = x.shape
    Dout = w.shape[1]
    Mp = _round_up(M, 8)
    tm = Mp if Mp <= tile_m else tile_m     # small M -> single grid step
    Mp = _round_up(Mp, tm)
    if Mp != M:
        x = jnp.pad(x, ((0, Mp - M), (0, 0)))
    _, vmem_limit = _vmem_caps()
    out = pl.pallas_call(
        _linear_kernel,
        out_shape=jax.ShapeDtypeStruct((Mp, Dout), jnp.float32),
        grid=(Mp // tm,),
        in_specs=[
            pl.BlockSpec((tm, Din), lambda i: (i, 0)),
            _const_spec((Din, Dout)),
            _const_spec((1, Dout)),
        ],
        out_specs=pl.BlockSpec((tm, Dout), lambda i: (i, 0)),
        compiler_params=pltpu.CompilerParams(
            dimension_semantics=("parallel",),
            vmem_limit_bytes=vmem_limit),
    )(x, w, b.reshape(1, -1))
    return out[:M]


# ----------------------------------------------------------------------------
# Kernel 3: time-blocked LSTM recurrence.  grid = (ceil(T/Tc),), each step
# consumes a (Tc, B, 4*Hp) slab of precomputed input-projection gates and runs
# an unrolled inner loop; h/c/last_h persist in VMEM scratch across blocks.
# The lang Linear is applied to last_h on the final block.
# ----------------------------------------------------------------------------
def _lstm_recurrent_kernel(gx_ref, len_ref, whh_ref, wl_ref, bl_ref, o_ref,
                           h_sc, c_sc, last_sc):
    tb = pl.program_id(0)
    Tc = gx_ref.shape[0]
    Hp = whh_ref.shape[0]

    @pl.when(tb == 0)
    def _():
        h_sc[...] = jnp.zeros_like(h_sc)
        c_sc[...] = jnp.zeros_like(c_sc)
        last_sc[...] = jnp.zeros_like(last_sc)

    lens = len_ref[...]                                    # (B, 1) int32
    whh = _prep_rhs(whh_ref[...])                          # hoist bf16 cast
    t0 = tb * Tc

    def step(i, carry):
        h, c, last = carry
        # only the small recurrent matmul sits on the serial critical path
        gates = gx_ref[i] + _mxu_dot_rhs(h, whh)           # (B, 4*Hp)
        # lane-aligned gate slices (Hp is a multiple of 128)
        i_g = jax.nn.sigmoid(gates[:, 0 * Hp:1 * Hp])
        f_g = jax.nn.sigmoid(gates[:, 1 * Hp:2 * Hp])
        g_g = jnp.tanh(gates[:, 2 * Hp:3 * Hp])
        o_g = jax.nn.sigmoid(gates[:, 3 * Hp:4 * Hp])
        c = f_g * c + i_g * g_g
        h = o_g * jnp.tanh(c)
        is_last = lens == (t0 + i + 1)                     # (B, 1)
        last = jnp.where(is_last, h, last)
        return (h, c, last)

    h, c, last = lax.fori_loop(
        0, Tc, step, (h_sc[...], c_sc[...], last_sc[...]), unroll=True)
    h_sc[...] = h
    c_sc[...] = c
    last_sc[...] = last

    @pl.when(tb == pl.num_programs(0) - 1)
    def _():
        o_ref[...] = (_mxu_dot(last, wl_ref[...]) + bl_ref[...]).astype(o_ref.dtype)


def encode_query_pallas(padded_query, query_length,
                        w_ih, w_hh, b_lstm, w_lang, b_lang):
    B, T, Dl = padded_query.shape
    H = w_hh.shape[0]
    E = w_lang.shape[1]
    Hp = _round_up(H, 128)

    # Lane-align each gate block (padded hidden lanes stay exactly zero:
    # zero gate pre-activations -> c_pad = 0, h_pad = 0 every step).
    def pad_gate_cols(w):                                   # (..., 4H) -> (..., 4Hp)
        parts = [w[..., k * H:(k + 1) * H] for k in range(4)]
        pad = [(0, 0)] * (w.ndim - 1) + [(0, Hp - H)]
        return jnp.concatenate([jnp.pad(p, pad) for p in parts], axis=-1)

    w_ih_p = pad_gate_cols(w_ih)                            # (Dl, 4Hp)
    w_hh_p = jnp.pad(pad_gate_cols(w_hh), ((0, Hp - H), (0, 0)))  # (Hp, 4Hp)
    b_p = pad_gate_cols(b_lstm.reshape(1, -1)).reshape(-1)  # (4Hp,)
    w_lang_p = jnp.pad(w_lang, ((0, Hp - H), (0, 0)))       # (Hp, E)

    # Block the time axis to amortize per-grid-step overhead (~0.35us/step).
    Tc = T if T <= 16 else 16
    Tpad = _round_up(T, Tc)
    if Tpad != T:
        padded_query = jnp.pad(padded_query, ((0, 0), (0, Tpad - T), (0, 0)))

    # Hoist the input projection: one well-shaped MXU matmul over all steps.
    x_tm = jnp.transpose(padded_query, (1, 0, 2)).reshape(Tpad * B, Dl)
    gates_x = linear_pallas(x_tm, w_ih_p, b_p).reshape(Tpad, B, 4 * Hp)

    lens = query_length.astype(jnp.int32).reshape(B, 1)
    _, vmem_limit = _vmem_caps()
    return pl.pallas_call(
        _lstm_recurrent_kernel,
        out_shape=jax.ShapeDtypeStruct((B, E), jnp.float32),
        grid=(Tpad // Tc,),
        in_specs=[
            pl.BlockSpec((Tc, B, 4 * Hp), lambda tb: (tb, 0, 0)),
            _const_spec((B, 1)),
            _const_spec((Hp, 4 * Hp)),
            _const_spec((Hp, E)),
            _const_spec((1, E)),
        ],
        out_specs=pl.BlockSpec((B, E), lambda tb: (0, 0)),
        scratch_shapes=[pltpu.VMEM((B, Hp), jnp.float32)] * 3,
        compiler_params=pltpu.CompilerParams(
            dimension_semantics=("arbitrary",),
            vmem_limit_bytes=vmem_limit),
    )(gates_x, lens, w_hh_p, w_lang_p, b_lang.reshape(1, -1))


# ----------------------------------------------------------------------------
# Parameter init (matches SMCNCL shapes; biases zero, weights U(-0.08, 0.08))
# ----------------------------------------------------------------------------
def init_params(key, visual_size, visual_hidden, embedding_size, lang_size, lang_hidden):
    ks = jax.random.split(key, 6)
    u = lambda k, shape: jax.random.uniform(k, shape, jnp.float32, -0.08, 0.08)
    return {
        # visual_encoder: Linear(Dv,H) -> ReLU -> Linear(H,E) -> Dropout (identity)
        "w1": u(ks[0], (visual_size, visual_hidden)),
        "b1": jnp.zeros((visual_hidden,), jnp.float32),
        "w2": u(ks[1], (visual_hidden, embedding_size)),
        "b2": jnp.zeros((embedding_size,), jnp.float32),
        # sentence_encoder: single-layer unidirectional LSTM, gate order (i,f,g,o)
        "w_ih": u(ks[2], (lang_size, 4 * lang_hidden)),
        "w_hh": u(ks[3], (lang_hidden, 4 * lang_hidden)),
        "b_lstm": jnp.zeros((4 * lang_hidden,), jnp.float32),   # bias_ih + bias_hh
        # lang_encoder
        "w_lang": u(ks[4], (lang_hidden, embedding_size)),
        "b_lang": jnp.zeros((embedding_size,), jnp.float32),
    }


# ----------------------------------------------------------------------------
# SMCNCL forward
# ----------------------------------------------------------------------------
def smcncl_forward(params, padded_query, query_length, visual_pos,
                   visual_neg_intra=None, visual_neg_inter=None):
    l_emb = encode_query_pallas(
        padded_query, query_length,
        params["w_ih"], params["w_hh"], params["b_lstm"],
        params["w_lang"], params["b_lang"])                     # (B, E)

    def branch(v):
        if v is None:
            return None, None
        return fused_visual_compare_pallas(
            v["feat"],
            v["mask"].astype(jnp.float32),
            v["mask_clip"].astype(jnp.float32),
            l_emb, params["w1"], params["b1"], params["w2"], params["b2"])

    c_pos, c_pos_clip = branch(visual_pos)
    c_ni, c_ni_clip = branch(visual_neg_intra)
    c_ne, c_ne_clip = branch(visual_neg_inter)
    return (c_pos, c_ni, c_ne, c_pos_clip, c_ni_clip, c_ne_clip)


# ----------------------------------------------------------------------------
# Pure-JAX reference (same bf16-MXU dot helper, so the check is apples-to-apples)
# ----------------------------------------------------------------------------
def _reference_forward(params, padded_query, query_length, branches):
    B, T, Dl = padded_query.shape
    H = params["w_hh"].shape[0]

    def step(carry, x_t):
        h, c = carry
        gates = (_mxu_dot(x_t, params["w_ih"]) + _mxu_dot(h, params["w_hh"])
                 + params["b_lstm"])
        i = jax.nn.sigmoid(gates[:, 0 * H:1 * H])
        f = jax.nn.sigmoid(gates[:, 1 * H:2 * H])
        g = jnp.tanh(gates[:, 2 * H:3 * H])
        o = jax.nn.sigmoid(gates[:, 3 * H:4 * H])
        c = f * c + i * g
        h = o * jnp.tanh(c)
        return (h, c), h

    z = jnp.zeros((B, H), jnp.float32)
    _, hs = lax.scan(step, (z, z), jnp.transpose(padded_query, (1, 0, 2)))
    last_h = hs[query_length - 1, jnp.arange(B)]
    l_emb = _mxu_dot(last_h, params["w_lang"]) + params["b_lang"]

    outs = []
    for br in branches:
        feat, mask, clip = br["feat"], br["mask"], br["mask_clip"]
        Bv, N, D = feat.shape
        h1 = jnp.maximum(_mxu_dot(feat.reshape(-1, D), params["w1"]) + params["b1"], 0.0)
        v = (_mxu_dot(h1, params["w2"]) + params["b2"]).reshape(Bv, N, -1)
        d = jnp.sum((v - l_emb[:, None, :]) ** 2, axis=-1)
        outs.append((jnp.sum(d * mask, -1) / jnp.sum(mask, -1),
                     jnp.sum(d * clip, -1) / jnp.sum(clip, -1)))
    return outs


if __name__ == "__main__":
    # small shapes consistent with SMCNCL's forward
    B, N, T = 2, 8, 8
    visual_size, visual_hidden, embedding_size = 64, 32, 16
    lang_size, lang_hidden = 16, 32

    key = jax.random.PRNGKey(0)
    kp, kq, kv0, kv1, kv2 = jax.random.split(key, 5)
    params = init_params(kp, visual_size, visual_hidden, embedding_size,
                         lang_size, lang_hidden)

    padded_query = jax.random.normal(kq, (B, T, lang_size), jnp.float32)
    query_length = jnp.array([T, T - 2], jnp.int32)   # sorted desc., lengths >= 1

    def make_visual(k):
        feat = jax.random.normal(k, (B, N, visual_size), jnp.float32)
        mask = jnp.stack([jnp.ones((N,)),
                          (jnp.arange(N) < 5).astype(jnp.float32)]).astype(jnp.float32)
        mask_clip = jnp.stack([
            (jnp.arange(N) == 2).astype(jnp.float32),
            (jnp.arange(N) == 0).astype(jnp.float32),
        ])
        return {"feat": feat, "mask": mask, "mask_clip": mask_clip}

    visual_pos = make_visual(kv0)
    visual_neg_intra = make_visual(kv1)
    visual_neg_inter = make_visual(kv2)

    outs = smcncl_forward(params, padded_query, query_length,
                          visual_pos, visual_neg_intra, visual_neg_inter)
    outs = jax.block_until_ready(outs)
    assert all(o is not None and o.shape == (B,) for o in outs)
    assert all(bool(jnp.all(jnp.isfinite(o))) for o in outs)

    # numerical sanity check against a pure-JAX reference (same bf16 MXU dots)
    ref = _reference_forward(params, padded_query, query_length,
                             [visual_pos, visual_neg_intra, visual_neg_inter])
    got = [(outs[0], outs[3]), (outs[1], outs[4]), (outs[2], outs[5])]
    for (r_s, r_c), (g_s, g_c) in zip(ref, got):
        assert jnp.allclose(r_s, g_s, rtol=5e-2, atol=5e-3), (r_s, g_s)
        assert jnp.allclose(r_c, g_c, rtol=5e-2, atol=5e-3), (r_c, g_c)

    print("KERNEL_OK")
</pallas_src>

<mosaic_0001>
module attributes {stable_mosaic.version = 11 : i64} {
  func.func @_linear_kernel(%arg0: i32, %arg1: memref<16x16xf32, #tpu.memory_space<vmem>>, %arg2: memref<16x512xf32, #tpu.memory_space<vmem>>, %arg3: memref<1x512xf32, #tpu.memory_space<vmem>>, %arg4: memref<16x512xf32, #tpu.memory_space<vmem>>) attributes {dimension_semantics = [#tpu.dimension_semantics<parallel>], iteration_bounds = array<i64: 1>, scalar_prefetch = 0 : i64, scratch_operands = 0 : i64, tpu.core_type = #tpu.core_type<tc>, window_params = [{transform_indices = @transform_0, window_bounds = array<i64: 16, 16>}, {pipeline_mode = #tpu.pipeline_mode<synchronous>, transform_indices = @transform_1, window_bounds = array<i64: 16, 512>}, {pipeline_mode = #tpu.pipeline_mode<synchronous>, transform_indices = @transform_2, window_bounds = array<i64: 1, 512>}, {transform_indices = @transform_3, window_bounds = array<i64: 16, 512>}]} {
    %c0 = arith.constant 0 : index
    %c0_0 = arith.constant 0 : index
    %0 = vector.load %arg1[%c0, %c0_0] : memref<16x16xf32, #tpu.memory_space<vmem>>, vector<16x16xf32>
    %c0_1 = arith.constant 0 : index
    %c0_2 = arith.constant 0 : index
    %1 = vector.load %arg2[%c0_1, %c0_2] : memref<16x512xf32, #tpu.memory_space<vmem>>, vector<16x512xf32>
    %2 = arith.truncf %0 : vector<16x16xf32> to vector<16x16xbf16>
    %3 = arith.truncf %1 : vector<16x512xf32> to vector<16x512xbf16>
    %cst = arith.constant dense<0.000000e+00> : vector<16x512xf32>
    %4 = tpu.matmul %2, %3, %cst {dimension_numbers = #tpu.dot_dimension_numbers<[1], [0], [0], [1], [0, 0, 1, 1], [], []>} : vector<16x16xbf16>, vector<16x512xbf16>, vector<16x512xf32> -> vector<16x512xf32>
    %c0_3 = arith.constant 0 : index
    %c0_4 = arith.constant 0 : index
    %5 = vector.load %arg3[%c0_3, %c0_4] : memref<1x512xf32, #tpu.memory_space<vmem>>, vector<1x512xf32>
    %6 = vector.broadcast %5 : vector<1x512xf32> to vector<16x512xf32>
    %7 = arith.addf %4, %6 : vector<16x512xf32>
    %c0_5 = arith.constant 0 : index
    %c0_6 = arith.constant 0 : index
    %8 = vector.load %arg4[%c0_5, %c0_6] : memref<16x512xf32, #tpu.memory_space<vmem>>, vector<16x512xf32>
    tpu.vector_store %arg4[%c0_5, %c0_6], %7 {strides = array<i32>} : memref<16x512xf32, #tpu.memory_space<vmem>>, vector<16x512xf32>,
    return
  }
  func.func @transform_0(%arg0: i32) -> (i32, i32) {
    %c0_i32 = arith.constant 0 : i32
    %c0_i32_0 = arith.constant 0 : i32
    return %arg0, %c0_i32 : i32, i32
  }
  func.func @transform_1(%arg0: i32) -> (i32, i32) {
    %c0_i32 = arith.constant 0 : i32
    %c0_i32_0 = arith.constant 0 : i32
    %c0_i32_1 = arith.constant 0 : i32
    return %c0_i32, %c0_i32_0 : i32, i32
  }
  func.func @transform_2(%arg0: i32) -> (i32, i32) {
    %c0_i32 = arith.constant 0 : i32
    %c0_i32_0 = arith.constant 0 : i32
    %c0_i32_1 = arith.constant 0 : i32
    return %c0_i32, %c0_i32_0 : i32, i32
  }
  func.func @transform_3(%arg0: i32) -> (i32, i32) {
    %c0_i32 = arith.constant 0 : i32
    %c0_i32_0 = arith.constant 0 : i32
    return %arg0, %c0_i32 : i32, i32
  }
}

</mosaic_0001>

<bundles_post_ra>
// kernel: tpu_custom_call.1
= control target key start
LH: loop header
LB: loop body
LE: loop exit
PB: predicated region body
PF: predicated region fallthrough
CT: control target
= control target key end

     0   :  { %8 = vsyncpa [#allocation3], 0  ;;  %s352_s0 = inlined_call_operand.hbm [shape: f32[16,16], index: 0, kind: input, shape index: {}]   ;;  %s353_s1 = inlined_call_operand.hbm [shape: f32[16,512], index: 1, kind: input, shape index: {}]   ;;  %s354_s2 = inlined_call_operand.hbm [shape: f32[1,512], index: 2, kind: input, shape index: {}]   ;;  %s355_s3 = inlined_call_operand.hbm [shape: f32[16,512], index: 3, kind: output, shape index: {}]  }
   0x1   :  { %9 = vsyncpa [#allocation6], 0 }
   0x2   :  { %10 = vsyncpa [#allocation4], 0  ;;  %s305_s12 = smov [#allocation5]  }
   0x3   :  { %s28_s13 = sshll.u32 %s305_s12, 4  ;;  %s29_s13 = int_to_ptr.vmem [resolvable:$true] %s28_s13 }
   0x4   :  { %s227_s14 = scalar_lea.vmem %s29_s13, 1024  ;;  %p232_p1 = scmp.lt.s32.totalorder %s29_s13, %s29_s13 }
   0x5   :  { %p228_p0 = scmp.ne.s32.totalorder %s29_s13, %s227_s14  ;;  %p233_p2 = scmp.lt.s32.totalorder %s227_s14, %s227_s14 }
   0x7   :  { %p234_p3 = por %p233_p2, %p232_p1 }
   0x9   :  { %p235_p4 = pnand %p234_p3, %p228_p0 }
   0xb   :  { %238 = shalt.err (!%p235_p4)
}
   0xc   :  { %s306_s15 = smov 512   ;;  %s307_s16 = smov 32  }
   0xd   :  { %34 = dma.hbm_to_vmem [thread:$0]  %s353_s1, 1024, %s29_s13, [#allocation6], %s306_s15, %s306_s15, %s307_s16  }
   0xe   :  { %s308_s19 = smov [#allocation2]  }
   0xf   :  { %s16_s20 = sshll.u32 %s308_s19, 4  ;;  %s17_s20 = int_to_ptr.vmem [resolvable:$true] %s16_s20 }
  0x10   :  { %s247_s21 = scalar_lea.vmem %s17_s20, 256  ;;  %p252_p6 = scmp.lt.s32.totalorder %s17_s20, %s17_s20 }
  0x11   :  { %p248_p5 = scmp.ne.s32.totalorder %s17_s20, %s247_s21  ;;  %p253_p7 = scmp.lt.s32.totalorder %s247_s21, %s247_s21 }
  0x13   :  { %p254_p8 = por %p253_p7, %p252_p6 }
  0x15   :  { %p255_p9 = pnand %p254_p8, %p248_p5 }
  0x17   :  { %258 = shalt.err (!%p255_p9)
}
  0x18   :  { %s309_s22 = smov 128   ;;  %s310_s23 = smov 8  }
  0x19   :  { %22 = dma.hbm_to_vmem [thread:$0]  %s352_s0, 256, %s17_s20, [#allocation3], %s309_s22, %s309_s22, %s310_s23  }
  0x1a   :  { %s311_s26 = smov [#allocation7]  }
  0x1b   :  { %s41_s27 = sshll.u32 %s311_s26, 4  ;;  %s42_s27 = int_to_ptr.vmem [resolvable:$true] %s41_s27 }
  0x1c   :  { %s267_s1 = scalar_lea.vmem %s42_s27, 64  ;;  %p272_p11 = scmp.lt.s32.totalorder %s42_s27, %s42_s27 }
  0x1d   :  { %p268_p10 = scmp.ne.s32.totalorder %s42_s27, %s267_s1  ;;  %p273_p12 = scmp.lt.s32.totalorder %s267_s1, %s267_s1 }
  0x1f   :  { %p274_p13 = por %p273_p12, %p272_p11 }
  0x21   :  { %p275_p0 = pnand %p274_p13, %p268_p10 }
  0x23   :  { %278 = shalt.err (!%p275_p0)
}
  0x24   :  { %44 = dma.hbm_to_vmem [thread:$0]  %s354_s2, 64, %s42_s27, [#allocation6]  }
  0x25   :  { %299 = dma.done.wait [#allocation3], 256  }
  0x26   :  { %300 = vsyncadd [#allocation3], 4294967040 }
  0x27   :  { %301 = dma.done.wait [#allocation6], 1088  }
  0x28   :  { %302 = vsyncadd [#allocation6], 4294966208  ;;  %v312_v0 = vmov 0   ;;  %v58_v1 = vld [vmem:[#allocation5 + $0x8] sm:$0xff]  ;;  %v60_v3 = vld [vmem:[#allocation5 + $0x18] sm:$0xff]  ;;  %vm92_vm0 = vcmask 130048   ;;  %v72_v16 = vlaneseq }
  0x29   :  { %128 = vmatprep.mubr.bf16.mxu0 %v312_v0  ;;  %171 = vmatprep.mubr.bf16.mxu1 %v312_v0  ;;  %v62_v2 = vld [vmem:[#allocation5 + $0x28] sm:$0xff]  ;;  %v64_v5 = vld [vmem:[#allocation5 + $0x38] sm:$0xff]  ;;  %v57_v6 = vld [vmem:[#allocation5] sm:$0xff]  ;;  %s313_s0 = smov [#allocation8]  }
  0x2a   :  { %v67_v4 = vpack.c.bf16 %v62_v2, %v58_v1  ;;  %v61_v7 = vld [vmem:[#allocation5 + $0x20] sm:$0xff]  ;;  %v69_v8 = vpack.c.bf16 %v64_v5, %v60_v3  ;;  %v59_v10 = vld [vmem:[#allocation5 + $0x10] sm:$0xff]  ;;  %v56_v14 = vld [vmem:[#allocation2 + $0x8] sm:$0xff]  ;;  %v73_v17 = vshrl.u32 %v72_v16, 7  ;;  %s195_s2 = sshll.u32 %s313_s0, 4  ;;  %s196_s2 = int_to_ptr.vmem [resolvable:$true] %s195_s2 }
  0x2b   :  { %v66_v9 = vpack.c.bf16 %v61_v7, %v57_v6  ;;  %v63_v11 = vld [vmem:[#allocation5 + $0x30] sm:$0xff]  ;;  %v70_v19 = vld [vmem:[#allocation7] sm:$0xf]  ;;  %s279_s30 = scalar_lea.vmem %s196_s2, 1024  ;;  %p284_p2 = scmp.lt.s32.totalorder %s196_s2, %s196_s2 }
  0x2c   :  { %v55_v12 = vld [vmem:[#allocation2] sm:$0xff]  ;;  %110 = vmatprep.subr.bf16.mxu0 %v67_v4  ;;  %v68_v13 = vpack.c.bf16 %v63_v11, %v59_v10  ;;  %153 = vmatprep.subr.bf16.mxu1 %v69_v8  ;;  %v74_v18 = vsub.s32 0, %v73_v17  ;;  %v82_v20 = vsub.s32 2, %v73_v17  ;;  %v78_v21 = vsub.s32 1, %v73_v17  ;;  %p280_p1 = scmp.ne.s32.totalorder %s196_s2, %s279_s30  ;;  %p285_p3 = scmp.lt.s32.totalorder %s279_s30, %s279_s30 }
  0x2d   :  { %111 = vmatpush1.bf16.msra.mxu0 %v66_v9  ;;  %v65_v15 = vpack.c.bf16 %v56_v14, %v55_v12  ;;  %v86_v22 = vsub.s32 3, %v73_v17 }
  0x2e   :  { %154 = vmatpush1.bf16.msra.mxu1 %v68_v13  ;;  %v75_v23 = vrot.slane %v70_v19, %v74_v18  ;;  %v83_v24 = vrot.slane %v70_v19, %v82_v20  ;;  %v79_v25 = vrot.slane %v70_v19, %v78_v21  ;;  %p286_p4 = por %p285_p3, %p284_p2 }
  0x2f   :  { %v87_v27 = vrot.slane %v70_v19, %v86_v22 }
  0x30   :  { %208 = vmatmul.mubr.msk.bf16.vlgmr.msra.gmra.mxu0 %vm92_vm0, %v65_v15  ;;  %p287_p5 = pnand %p286_p4, %p280_p1 }
  0x31   :  { %209 = vmatmul.mubr.msk.bf16.vlgmr.msra.gmra.mxu1 %vm92_vm0, %v65_v15 }
  0xf0   :  { %v130_v26 = vpop.f32.mrf.mxu0 }
  0xf1   :  { %v131_v28 = vadd.f32 %v130_v26, %v75_v23  ;;  %v173_v29 = vpop.f32.mrf.mxu1 }
  0xf2   :  { %v174_v30 = vadd.f32 %v173_v29, %v83_v24  ;;  %v132_v31 = vpop.f32.mrf.mxu0 }
  0xf3   :  { %182 = vst [vmem:[#allocation8] sm:$0xff] %v131_v28  ;;  %v133_v32 = vadd.f32 %v132_v31, %v79_v25  ;;  %v175_v33 = vpop.f32.mrf.mxu1 }
  0xf4   :  { %184 = vst [vmem:[#allocation8 + $0x10] sm:$0xff] %v174_v30  ;;  %v176_v34 = vadd.f32 %v175_v33, %v87_v27  ;;  %v134_v35 = vpop.f32.mrf.mxu0 }
  0xf5   :  { %183 = vst [vmem:[#allocation8 + $0x8] sm:$0xff] %v133_v32  ;;  %v135_v36 = vadd.f32 %v134_v35, %v75_v23  ;;  %v177_v37 = vpop.f32.mrf.mxu1 }
  0xf6   :  { %185 = vst [vmem:[#allocation8 + $0x18] sm:$0xff] %v176_v34  ;;  %v178_v38 = vadd.f32 %v177_v37, %v83_v24  ;;  %v136_v39 = vpop.f32.mrf.mxu0 }
  0xf7   :  { %186 = vst [vmem:[#allocation8 + $0x20] sm:$0xff] %v135_v36  ;;  %v137_v40 = vadd.f32 %v136_v39, %v79_v25  ;;  %v179_v41 = vpop.f32.mrf.mxu1 }
  0xf8   :  { %188 = vst [vmem:[#allocation8 + $0x30] sm:$0xff] %v178_v38  ;;  %v180_v42 = vadd.f32 %v179_v41, %v87_v27 }
  0xf9   :  { %187 = vst [vmem:[#allocation8 + $0x28] sm:$0xff] %v137_v40 }
  0xfa   :  { %189 = vst [vmem:[#allocation8 + $0x38] sm:$0xff] %v180_v42 }
  0xfb   :  { %290 = shalt.err (!%p287_p5)
}
  0xfc   :  { %201 = dma.vmem_to_hbm [thread:$0]  %s196_s2, 1024, %s355_s3, [#allocation4], %s306_s15, %s306_s15, %s307_s16  }
  0xfd   :  { %303 = dma.done.wait [#allocation4], 1024  }
  0xfe   :  { %304 = vsyncadd [#allocation4], 4294966272 }
  0xff   :  { %205 = vsyncpa [#allocation3], 1 }
 0x100   :  { %206 = vsyncpa [#allocation6], 1 }
 0x101   :  { %207 = vsyncpa [#allocation4], 1 }

</bundles_post_ra>
